<compile_context>
chip_gen: v5e
topology: v5e:2x2
jax: 0.10.0
libtpu: 0.0.40
codegen_flags: <defaults>
</compile_context>

<pallas_src>
import math
import functools

import jax
import jax.numpy as jnp
from jax.experimental import pallas as pl
from jax.experimental.pallas import tpu as pltpu


# ------------------------------ Pallas kernels ------------------------------

def _mha_block_kernel(q_ref, kv_ref, m_ref, wq_ref, wkv_ref, fc_ref, o_ref, *,
                      num_heads, scale):
    """One batch element: QKV proj -> per-head attention -> out proj -> +res -> LN."""
    x_q = q_ref[...]            # [Sq, D]  (query; also the residual)
    x_kv = kv_ref[...]          # [Sk, D]  (key == value source)
    m = m_ref[...]              # [Sq, Sk] float, 1.0 = masked out
    D = x_q.shape[-1]
    dk = D // num_heads

    q = jnp.dot(x_q, wq_ref[...], preferred_element_type=jnp.float32)      # [Sq, D]
    kv = jnp.dot(x_kv, wkv_ref[...], preferred_element_type=jnp.float32)   # [Sk, 2D]
    k = kv[:, :D]
    v = kv[:, D:]

    # Accumulate residual + (ctx @ fc) head-by-head (block decomposition of the
    # full fc matmul) -- no concatenation / transposes needed inside the kernel.
    acc = x_q
    for h in range(num_heads):
        sl = slice(h * dk, (h + 1) * dk)
        s = jnp.dot(q[:, sl], k[:, sl].T, preferred_element_type=jnp.float32) * scale
        s = jnp.where(m > 0.0, -1e9, s)
        s = s - jnp.max(s, axis=-1, keepdims=True)
        e = jnp.exp(s)
        p = e * pl.reciprocal(jnp.sum(e, axis=-1, keepdims=True), approx=True)
        ctx_h = jnp.dot(p, v[:, sl], preferred_element_type=jnp.float32)    # [Sq, dk]
        acc = acc + jnp.dot(ctx_h, fc_ref[sl, :], preferred_element_type=jnp.float32)

    # Fresh nn.LayerNorm(d_model): gamma=1, beta=0, eps=1e-5
    mean = jnp.mean(acc, axis=-1, keepdims=True)
    var = jnp.mean((acc - mean) ** 2, axis=-1, keepdims=True)
    o_ref[...] = (acc - mean) * jax.lax.rsqrt(var + 1e-5)


def pallas_mha_block(query, kv, mask, wq, wkv, fc_w, num_heads):
    """query: [B,Sq,D] (also residual), kv: [B,Sk,D], mask: [B,Sq,Sk] (1.0=masked)."""
    B, Sq, D = query.shape
    Sk = kv.shape[1]
    scale = 1.0 / math.sqrt(D // num_heads)
    kern = functools.partial(_mha_block_kernel, num_heads=num_heads, scale=scale)
    return pl.pallas_call(
        kern,
        out_shape=jax.ShapeDtypeStruct((B, Sq, D), jnp.float32),
        grid=(B,),
        in_specs=[
            pl.BlockSpec((None, Sq, D), lambda b: (b, 0, 0)),    # query (squeezed B)
            pl.BlockSpec((None, Sk, D), lambda b: (b, 0, 0)),    # key/value source
            pl.BlockSpec((None, Sq, Sk), lambda b: (b, 0, 0)),   # mask (once per batch)
            pl.BlockSpec((D, D), lambda b: (0, 0)),              # wq   (resident)
            pl.BlockSpec((D, 2 * D), lambda b: (0, 0)),          # [wk|wv]
            pl.BlockSpec((D, D), lambda b: (0, 0)),              # fc
        ],
        out_specs=pl.BlockSpec((None, Sq, D), lambda b: (b, 0, 0)),
        compiler_params=pltpu.CompilerParams(
            dimension_semantics=("parallel",)),
    )(query, kv, mask, wq, wkv, fc_w)


def _ffn_block_kernel(x_ref, w1_ref, b1_ref, w2_ref, b2_ref, o_ref):
    """Linear -> Dropout(identity) -> ReLU -> Linear -> +residual -> LayerNorm."""
    x = x_ref[...]                                                         # [S, D]
    h = jnp.dot(x, w1_ref[...], preferred_element_type=jnp.float32) + b1_ref[...]
    h = jnp.maximum(h, 0.0)
    y = jnp.dot(h, w2_ref[...], preferred_element_type=jnp.float32) + b2_ref[...] + x
    mean = jnp.mean(y, axis=-1, keepdims=True)
    var = jnp.mean((y - mean) ** 2, axis=-1, keepdims=True)
    o_ref[...] = (y - mean) * jax.lax.rsqrt(var + 1e-5)


def pallas_ffn_block(x, w1, b1, w2, b2):
    B, S, D = x.shape
    FF = w1.shape[1]
    return pl.pallas_call(
        _ffn_block_kernel,
        out_shape=jax.ShapeDtypeStruct((B, S, D), jnp.float32),
        grid=(B,),
        in_specs=[
            pl.BlockSpec((None, S, D), lambda b: (b, 0, 0)),
            pl.BlockSpec((D, FF), lambda b: (0, 0)),
            pl.BlockSpec((1, FF), lambda b: (0, 0)),
            pl.BlockSpec((FF, D), lambda b: (0, 0)),
            pl.BlockSpec((1, D), lambda b: (0, 0)),
        ],
        out_specs=pl.BlockSpec((None, S, D), lambda b: (b, 0, 0)),
        compiler_params=pltpu.CompilerParams(
            dimension_semantics=("parallel",)),
    )(x, w1, b1, w2, b2)


def _linear_bias_kernel(x_ref, w_ref, b_ref, o_ref):
    o_ref[...] = (
        jnp.dot(x_ref[...], w_ref[...], preferred_element_type=jnp.float32)
        + b_ref[...]
    )


def pallas_linear(x2d, w, b2d):
    M = x2d.shape[0]
    N = w.shape[1]
    return pl.pallas_call(
        _linear_bias_kernel,
        out_shape=jax.ShapeDtypeStruct((M, N), jnp.float32),
    )(x2d, w, b2d)


# --------------------------- model building blocks ---------------------------

def multihead_attention(query, kv, attn_mask, p, num_heads):
    # residual = query (matches reference, including the dec_enc quirk)
    return pallas_mha_block(query, kv, attn_mask, p["q_w"], p["kv_w"], p["fc_w"],
                            num_heads)


def feedforward(x, p):
    return pallas_ffn_block(x, p["w1"], p["b1"], p["w2"], p["b2"])


def make_pe(d_model, max_len=64):
    position = jnp.arange(max_len, dtype=jnp.float32)[:, None]
    div_term = jnp.exp(
        jnp.arange(0, d_model, 2, dtype=jnp.float32) * (-math.log(10000.0) / d_model)
    )
    pe = jnp.zeros((max_len, d_model), jnp.float32)
    pe = pe.at[:, 0::2].set(jnp.sin(position * div_term))
    pe = pe.at[:, 1::2].set(jnp.cos(position * div_term))
    return pe[:, None, :]          # [max_len, 1, d_model]


def get_attn_pad_mask(seq_q, seq_k):
    B, lq = seq_q.shape
    lk = seq_k.shape[1]
    pad = (seq_k == 0).astype(jnp.float32)[:, None, :]        # [B,1,lk]
    return jnp.broadcast_to(pad, (B, lq, lk))


def get_attn_subsequence_mask(seq):
    B, S = seq.shape
    tri = jnp.triu(jnp.ones((S, S), jnp.float32), k=1)
    return jnp.broadcast_to(tri[None], (B, S, S))


def transformer_forward(enc_inputs, dec_inputs, params, cfg):
    B, S = enc_inputs.shape
    d, H = cfg["d_model"], cfg["nums_head"]
    pe = params["pe"]

    # ---- encoder ----
    x = params["src_emb"][enc_inputs] + pe[:B]          # pe indexed by batch (as in ref)
    enc_attn_mask = get_attn_pad_mask(enc_inputs, enc_inputs)
    for lp in params["enc_layers"]:
        x = multihead_attention(x, x, enc_attn_mask, lp["attn"], H)
        x = feedforward(x, lp["ffn"])
    enc_outputs = x

    # ---- decoder ----
    y = params["tgt_emb"][dec_inputs] + pe[:B]
    pad = get_attn_pad_mask(dec_inputs, dec_inputs)
    sub = get_attn_subsequence_mask(dec_inputs)
    dec_self_mask = ((pad + sub) > 0).astype(jnp.float32)
    dec_enc_mask = get_attn_pad_mask(dec_inputs, enc_inputs)
    for lp in params["dec_layers"]:
        y = multihead_attention(y, y, dec_self_mask, lp["self_attn"], H)
        # NB: reference passes encoder output as query/residual here.
        y = multihead_attention(enc_outputs, y, dec_enc_mask, lp["enc_attn"], H)
        y = feedforward(y, lp["ffn"])

    # final projection, lane-padded to a 128 multiple then sliced back
    logits_pad = pallas_linear(y.reshape(B * S, d),
                               params["proj_w_pad"], params["proj_b_pad"])
    return logits_pad[:, : cfg["vocab_dec_size"]]        # [B*S, vocab_dec]


# ------------------------------- parameters -------------------------------

def _xavier(key, fan_in, fan_out):
    bound = math.sqrt(6.0 / (fan_in + fan_out))
    return jax.random.uniform(key, (fan_in, fan_out), jnp.float32, -bound, bound)


def _init_mha(key, d):
    k = jax.random.split(key, 4)
    k_w = _xavier(k[1], d, d)
    v_w = _xavier(k[2], d, d)
    return {
        "q_w": _xavier(k[0], d, d),
        "k_w": k_w,
        "v_w": v_w,
        "kv_w": jnp.concatenate([k_w, v_w], axis=1),      # fused [D, 2D] weight
        "fc_w": _xavier(k[3], d, d),
    }


def _init_ffn(key, d, ff):
    k = jax.random.split(key, 4)
    return {
        "w1": _xavier(k[0], d, ff),
        "b1": jax.random.uniform(k[1], (1, ff), jnp.float32,
                                 -1.0 / math.sqrt(d), 1.0 / math.sqrt(d)),
        "w2": _xavier(k[2], ff, d),
        "b2": jax.random.uniform(k[3], (1, d), jnp.float32,
                                 -1.0 / math.sqrt(ff), 1.0 / math.sqrt(ff)),
    }


def init_params(key, cfg):
    d, ff = cfg["d_model"], cfg["feedforward_dim"]
    vdec = cfg["vocab_dec_size"]
    keys = jax.random.split(key, 6 + 2 * cfg["n_layers"])
    proj_w = _xavier(keys[2], d, vdec)
    proj_b = jax.random.uniform(keys[3], (vdec,), jnp.float32,
                                -1.0 / math.sqrt(d), 1.0 / math.sqrt(d))
    n_pad = pl.cdiv(vdec, 128) * 128
    params = {
        "src_emb": jax.random.normal(keys[0], (cfg["vocab_enc_size"], d), jnp.float32),
        "tgt_emb": jax.random.normal(keys[1], (vdec, d), jnp.float32),
        "proj_w": proj_w,
        "proj_b": proj_b,
        "proj_w_pad": jnp.zeros((d, n_pad), jnp.float32).at[:, :vdec].set(proj_w),
        "proj_b_pad": jnp.zeros((1, n_pad), jnp.float32).at[0, :vdec].set(proj_b),
        "pe": make_pe(d),
        "enc_layers": [],
        "dec_layers": [],
    }
    for i in range(cfg["n_layers"]):
        ke = jax.random.split(keys[4 + i], 2)
        params["enc_layers"].append(
            {"attn": _init_mha(ke[0], d), "ffn": _init_ffn(ke[1], d, ff)}
        )
        kd = jax.random.split(keys[4 + cfg["n_layers"] + i], 3)
        params["dec_layers"].append(
            {"self_attn": _init_mha(kd[0], d),
             "enc_attn": _init_mha(kd[1], d),
             "ffn": _init_ffn(kd[2], d, ff)}
        )
    return params


# ---------------------------- pure-JAX reference ----------------------------

def _ref_ln(y):
    mean = y.mean(-1, keepdims=True)
    var = ((y - mean) ** 2).mean(-1, keepdims=True)
    return (y - mean) / jnp.sqrt(var + 1e-5)


def _ref_mha(q, kx, vx, mask, p, H):
    B, Sq, D = q.shape
    dk = D // H
    Q = (q @ p["q_w"]).reshape(B, Sq, H, dk).transpose(0, 2, 1, 3)
    K = (kx @ p["k_w"]).reshape(B, -1, H, dk).transpose(0, 2, 1, 3)
    V = (vx @ p["v_w"]).reshape(B, -1, H, dk).transpose(0, 2, 1, 3)
    s = jnp.einsum("bhqd,bhkd->bhqk", Q, K) / math.sqrt(dk)
    s = jnp.where(mask[:, None] > 0, -1e9, s)
    a = jax.nn.softmax(s, axis=-1)
    ctx = jnp.einsum("bhqk,bhkd->bhqd", a, V).transpose(0, 2, 1, 3).reshape(B, Sq, D)
    return _ref_ln(ctx @ p["fc_w"] + q)


def _ref_ffn(x, p):
    h = jnp.maximum(x @ p["w1"] + p["b1"], 0.0)
    return _ref_ln(h @ p["w2"] + p["b2"] + x)


def reference_forward(enc_inputs, dec_inputs, params, cfg):
    B, S = enc_inputs.shape
    d, H = cfg["d_model"], cfg["nums_head"]
    pe = params["pe"]
    x = params["src_emb"][enc_inputs] + pe[:B]
    enc_mask = get_attn_pad_mask(enc_inputs, enc_inputs)
    for lp in params["enc_layers"]:
        x = _ref_mha(x, x, x, enc_mask, lp["attn"], H)
        x = _ref_ffn(x, lp["ffn"])
    enc_out = x
    y = params["tgt_emb"][dec_inputs] + pe[:B]
    self_mask = ((get_attn_pad_mask(dec_inputs, dec_inputs)
                  + get_attn_subsequence_mask(dec_inputs)) > 0).astype(jnp.float32)
    de_mask = get_attn_pad_mask(dec_inputs, enc_inputs)
    for lp in params["dec_layers"]:
        y = _ref_mha(y, y, y, self_mask, lp["self_attn"], H)
        y = _ref_mha(enc_out, y, y, de_mask, lp["enc_attn"], H)
        y = _ref_ffn(y, lp["ffn"])
    return (y.reshape(B * S, d) @ params["proj_w"]) + params["proj_b"]


# ----------------------------------- main -----------------------------------

if __name__ == "__main__":
    cfg = dict(
        d_model=32, nums_head=4, feedforward_dim=64, n_layers=2,
        vocab_enc_size=40, vocab_dec_size=48, dropout=0.1,
    )
    B, S = 2, 8

    key = jax.random.PRNGKey(0)
    kp, ke, kd = jax.random.split(key, 3)
    params = init_params(kp, cfg)

    enc_inputs = jax.random.randint(ke, (B, S), 1, cfg["vocab_enc_size"], jnp.int32)
    dec_inputs = jax.random.randint(kd, (B, S), 1, cfg["vocab_dec_size"], jnp.int32)
    # put padding (token 0) at the tail to exercise the pad masks
    enc_inputs = enc_inputs.at[:, -1].set(0)
    dec_inputs = dec_inputs.at[:, -1].set(0)

    fwd = jax.jit(functools.partial(transformer_forward, cfg=cfg))
    logits = fwd(enc_inputs, dec_inputs, params)
    logits = jax.block_until_ready(logits)

    assert logits.shape == (B * S, cfg["vocab_dec_size"])
    assert bool(jnp.all(jnp.isfinite(logits)))

    ref = reference_forward(enc_inputs, dec_inputs, params, cfg)
    assert bool(jnp.allclose(logits, ref, rtol=2e-2, atol=2e-2))

    print("KERNEL_OK")
</pallas_src>

<mosaic_0001>
module attributes {stable_mosaic.version = 11 : i64} {
  func.func @_mha_block_kernel(%arg0: i32, %arg1: memref<1x8x32xf32, #tpu.memory_space<vmem>>, %arg2: memref<1x8x32xf32, #tpu.memory_space<vmem>>, %arg3: memref<1x8x8xf32, #tpu.memory_space<vmem>>, %arg4: memref<32x32xf32, #tpu.memory_space<vmem>>, %arg5: memref<32x64xf32, #tpu.memory_space<vmem>>, %arg6: memref<32x32xf32, #tpu.memory_space<vmem>>, %arg7: memref<1x8x32xf32, #tpu.memory_space<vmem>>) attributes {dimension_semantics = [#tpu.dimension_semantics<parallel>], iteration_bounds = array<i64: 2>, scalar_prefetch = 0 : i64, scratch_operands = 0 : i64, tpu.core_type = #tpu.core_type<tc>, window_params = [{transform_indices = @transform_0, window_bounds = array<i64: 1, 8, 32>}, {transform_indices = @transform_1, window_bounds = array<i64: 1, 8, 32>}, {transform_indices = @transform_2, window_bounds = array<i64: 1, 8, 8>}, {pipeline_mode = #tpu.pipeline_mode<synchronous>, transform_indices = @transform_3, window_bounds = array<i64: 32, 32>}, {pipeline_mode = #tpu.pipeline_mode<synchronous>, transform_indices = @transform_4, window_bounds = array<i64: 32, 64>}, {pipeline_mode = #tpu.pipeline_mode<synchronous>, transform_indices = @transform_5, window_bounds = array<i64: 32, 32>}, {transform_indices = @transform_6, window_bounds = array<i64: 1, 8, 32>}]} {
    %c0 = arith.constant 0 : index
    %c0_0 = arith.constant 0 : index
    %c0_1 = arith.constant 0 : index
    %0 = vector.load %arg1[%c0, %c0_0, %c0_1] : memref<1x8x32xf32, #tpu.memory_space<vmem>>, vector<1x8x32xf32>
    %1 = vector.shape_cast %0 : vector<1x8x32xf32> to vector<8x32xf32>
    %c0_2 = arith.constant 0 : index
    %c0_3 = arith.constant 0 : index
    %c0_4 = arith.constant 0 : index
    %2 = vector.load %arg2[%c0_2, %c0_3, %c0_4] : memref<1x8x32xf32, #tpu.memory_space<vmem>>, vector<1x8x32xf32>
    %3 = vector.shape_cast %2 : vector<1x8x32xf32> to vector<8x32xf32>
    %c0_5 = arith.constant 0 : index
    %c0_6 = arith.constant 0 : index
    %c0_7 = arith.constant 0 : index
    %4 = vector.load %arg3[%c0_5, %c0_6, %c0_7] : memref<1x8x8xf32, #tpu.memory_space<vmem>>, vector<1x8x8xf32>
    %5 = vector.shape_cast %4 : vector<1x8x8xf32> to vector<8x8xf32>
    %c0_8 = arith.constant 0 : index
    %c0_9 = arith.constant 0 : index
    %6 = vector.load %arg4[%c0_8, %c0_9] : memref<32x32xf32, #tpu.memory_space<vmem>>, vector<32x32xf32>
    %cst = arith.constant dense<0.000000e+00> : vector<8x32xf32>
    %7 = tpu.matmul %1, %6, %cst {dimension_numbers = #tpu.dot_dimension_numbers<[1], [0], [0], [1], [0, 0, 1, 1], [], []>} : vector<8x32xf32>, vector<32x32xf32>, vector<8x32xf32> -> vector<8x32xf32>
    %c0_10 = arith.constant 0 : index
    %c0_11 = arith.constant 0 : index
    %8 = vector.load %arg5[%c0_10, %c0_11] : memref<32x64xf32, #tpu.memory_space<vmem>>, vector<32x64xf32>
    %cst_12 = arith.constant dense<0.000000e+00> : vector<8x64xf32>
    %9 = tpu.matmul %3, %8, %cst_12 {dimension_numbers = #tpu.dot_dimension_numbers<[1], [0], [0], [1], [0, 0, 1, 1], [], []>} : vector<8x32xf32>, vector<32x64xf32>, vector<8x64xf32> -> vector<8x64xf32>
    %10 = vector.extract_strided_slice %9 {offsets = [0, 0], sizes = [8, 32], strides = [1, 1]} : vector<8x64xf32> to vector<8x32xf32>
    %11 = vector.extract_strided_slice %9 {offsets = [0, 32], sizes = [8, 32], strides = [1, 1]} : vector<8x64xf32> to vector<8x32xf32>
    %12 = vector.extract_strided_slice %7 {offsets = [0, 0], sizes = [8, 8], strides = [1, 1]} : vector<8x32xf32> to vector<8x8xf32>
    %13 = vector.extract_strided_slice %10 {offsets = [0, 0], sizes = [8, 8], strides = [1, 1]} : vector<8x32xf32> to vector<8x8xf32>
    %14 = tpu.transpose %13, [1, 0] : vector<8x8xf32> -> vector<8x8xf32>
    %cst_13 = arith.constant dense<0.000000e+00> : vector<8x8xf32>
    %15 = tpu.matmul %12, %14, %cst_13 {dimension_numbers = #tpu.dot_dimension_numbers<[1], [0], [0], [1], [0, 0, 1, 1], [], []>} : vector<8x8xf32>, vector<8x8xf32>, vector<8x8xf32> -> vector<8x8xf32>
    %cst_14 = arith.constant 0.353553385 : f32
    %16 = vector.broadcast %cst_14 : f32 to vector<8x8xf32>
    %17 = arith.mulf %15, %16 : vector<8x8xf32>
    %cst_15 = arith.constant 0.000000e+00 : f32
    %18 = vector.broadcast %cst_15 : f32 to vector<8x8xf32>
    %19 = arith.cmpf ogt, %5, %18 : vector<8x8xf32>
    %cst_16 = arith.constant -1.000000e+09 : f32
    %20 = vector.broadcast %cst_16 : f32 to vector<8x8xf32>
    %21 = arith.select %19, %20, %17 : vector<8x8xi1>, vector<8x8xf32>
    %cst_17 = arith.constant dense<0xFF800000> : vector<8xf32>
    %22 = vector.multi_reduction <maximumf>, %21, %cst_17 [1] : vector<8x8xf32> to vector<8xf32>
    %23 = vector.shape_cast %22 : vector<8xf32> to vector<8x1xf32>
    %24 = vector.broadcast %23 : vector<8x1xf32> to vector<8x8xf32>
    %25 = arith.subf %21, %24 : vector<8x8xf32>
    %26 = math.exp %25 : vector<8x8xf32>
    %cst_18 = arith.constant dense<0.000000e+00> : vector<8xf32>
    %27 = vector.multi_reduction <add>, %26, %cst_18 [1] : vector<8x8xf32> to vector<8xf32>
    %28 = vector.shape_cast %27 : vector<8xf32> to vector<8x1xf32>
    %29 = tpu.reciprocal %28 {approx = true} : vector<8x1xf32> -> vector<8x1xf32>
    %30 = vector.broadcast %29 : vector<8x1xf32> to vector<8x8xf32>
    %31 = arith.mulf %26, %30 : vector<8x8xf32>
    %32 = vector.extract_strided_slice %11 {offsets = [0, 0], sizes = [8, 8], strides = [1, 1]} : vector<8x32xf32> to vector<8x8xf32>
    %cst_19 = arith.constant dense<0.000000e+00> : vector<8x8xf32>
    %33 = tpu.matmul %31, %32, %cst_19 {dimension_numbers = #tpu.dot_dimension_numbers<[1], [0], [0], [1], [0, 0, 1, 1], [], []>} : vector<8x8xf32>, vector<8x8xf32>, vector<8x8xf32> -> vector<8x8xf32>
    %c0_20 = arith.constant 0 : index
    %c0_21 = arith.constant 0 : index
    %34 = vector.load %arg6[%c0_20, %c0_21] : memref<32x32xf32, #tpu.memory_space<vmem>>, vector<8x32xf32>
    %cst_22 = arith.constant dense<0.000000e+00> : vector<8x32xf32>
    %35 = tpu.matmul %33, %34, %cst_22 {dimension_numbers = #tpu.dot_dimension_numbers<[1], [0], [0], [1], [0, 0, 1, 1], [], []>} : vector<8x8xf32>, vector<8x32xf32>, vector<8x32xf32> -> vector<8x32xf32>
    %36 = arith.addf %1, %35 : vector<8x32xf32>
    %37 = vector.extract_strided_slice %7 {offsets = [0, 8], sizes = [8, 8], strides = [1, 1]} : vector<8x32xf32> to vector<8x8xf32>
    %38 = vector.extract_strided_slice %10 {offsets = [0, 8], sizes = [8, 8], strides = [1, 1]} : vector<8x32xf32> to vector<8x8xf32>
    %39 = tpu.transpose %38, [1, 0] : vector<8x8xf32> -> vector<8x8xf32>
    %cst_23 = arith.constant dense<0.000000e+00> : vector<8x8xf32>
    %40 = tpu.matmul %37, %39, %cst_23 {dimension_numbers = #tpu.dot_dimension_numbers<[1], [0], [0], [1], [0, 0, 1, 1], [], []>} : vector<8x8xf32>, vector<8x8xf32>, vector<8x8xf32> -> vector<8x8xf32>
    %cst_24 = arith.constant 0.353553385 : f32
    %41 = vector.broadcast %cst_24 : f32 to vector<8x8xf32>
    %42 = arith.mulf %40, %41 : vector<8x8xf32>
    %cst_25 = arith.constant 0.000000e+00 : f32
    %43 = vector.broadcast %cst_25 : f32 to vector<8x8xf32>
    %44 = arith.cmpf ogt, %5, %43 : vector<8x8xf32>
    %cst_26 = arith.constant -1.000000e+09 : f32
    %45 = vector.broadcast %cst_26 : f32 to vector<8x8xf32>
    %46 = arith.select %44, %45, %42 : vector<8x8xi1>, vector<8x8xf32>
    %cst_27 = arith.constant dense<0xFF800000> : vector<8xf32>
    %47 = vector.multi_reduction <maximumf>, %46, %cst_27 [1] : vector<8x8xf32> to vector<8xf32>
    %48 = vector.shape_cast %47 : vector<8xf32> to vector<8x1xf32>
    %49 = vector.broadcast %48 : vector<8x1xf32> to vector<8x8xf32>
    %50 = arith.subf %46, %49 : vector<8x8xf32>
    %51 = math.exp %50 : vector<8x8xf32>
    %cst_28 = arith.constant dense<0.000000e+00> : vector<8xf32>
    %52 = vector.multi_reduction <add>, %51, %cst_28 [1] : vector<8x8xf32> to vector<8xf32>
    %53 = vector.shape_cast %52 : vector<8xf32> to vector<8x1xf32>
    %54 = tpu.reciprocal %53 {approx = true} : vector<8x1xf32> -> vector<8x1xf32>
    %55 = vector.broadcast %54 : vector<8x1xf32> to vector<8x8xf32>
    %56 = arith.mulf %51, %55 : vector<8x8xf32>
    %57 = vector.extract_strided_slice %11 {offsets = [0, 8], sizes = [8, 8], strides = [1, 1]} : vector<8x32xf32> to vector<8x8xf32>
    %cst_29 = arith.constant dense<0.000000e+00> : vector<8x8xf32>
    %58 = tpu.matmul %56, %57, %cst_29 {dimension_numbers = #tpu.dot_dimension_numbers<[1], [0], [0], [1], [0, 0, 1, 1], [], []>} : vector<8x8xf32>, vector<8x8xf32>, vector<8x8xf32> -> vector<8x8xf32>
    %c8 = arith.constant 8 : index
    %c0_30 = arith.constant 0 : index
    %59 = vector.load %arg6[%c8, %c0_30] : memref<32x32xf32, #tpu.memory_space<vmem>>, vector<8x32xf32>
    %cst_31 = arith.constant dense<0.000000e+00> : vector<8x32xf32>
    %60 = tpu.matmul %58, %59, %cst_31 {dimension_numbers = #tpu.dot_dimension_numbers<[1], [0], [0], [1], [0, 0, 1, 1], [], []>} : vector<8x8xf32>, vector<8x32xf32>, vector<8x32xf32> -> vector<8x32xf32>
    %61 = arith.addf %36, %60 : vector<8x32xf32>
    %62 = vector.extract_strided_slice %7 {offsets = [0, 16], sizes = [8, 8], strides = [1, 1]} : vector<8x32xf32> to vector<8x8xf32>
    %63 = vector.extract_strided_slice %10 {offsets = [0, 16], sizes = [8, 8], strides = [1, 1]} : vector<8x32xf32> to vector<8x8xf32>
    %64 = tpu.transpose %63, [1, 0] : vector<8x8xf32> -> vector<8x8xf32>
    %cst_32 = arith.constant dense<0.000000e+00> : vector<8x8xf32>
    %65 = tpu.matmul %62, %64, %cst_32 {dimension_numbers = #tpu.dot_dimension_numbers<[1], [0], [0], [1], [0, 0, 1, 1], [], []>} : vector<8x8xf32>, vector<8x8xf32>, vector<8x8xf32> -> vector<8x8xf32>
    %cst_33 = arith.constant 0.353553385 : f32
    %66 = vector.broadcast %cst_33 : f32 to vector<8x8xf32>
    %67 = arith.mulf %65, %66 : vector<8x8xf32>
    %cst_34 = arith.constant 0.000000e+00 : f32
    %68 = vector.broadcast %cst_34 : f32 to vector<8x8xf32>
    %69 = arith.cmpf ogt, %5, %68 : vector<8x8xf32>
    %cst_35 = arith.constant -1.000000e+09 : f32
    %70 = vector.broadcast %cst_35 : f32 to vector<8x8xf32>
    %71 = arith.select %69, %70, %67 : vector<8x8xi1>, vector<8x8xf32>
    %cst_36 = arith.constant dense<0xFF800000> : vector<8xf32>
    %72 = vector.multi_reduction <maximumf>, %71, %cst_36 [1] : vector<8x8xf32> to vector<8xf32>
    %73 = vector.shape_cast %72 : vector<8xf32> to vector<8x1xf32>
    %74 = vector.broadcast %73 : vector<8x1xf32> to vector<8x8xf32>
    %75 = arith.subf %71, %74 : vector<8x8xf32>
    %76 = math.exp %75 : vector<8x8xf32>
    %cst_37 = arith.constant dense<0.000000e+00> : vector<8xf32>
    %77 = vector.multi_reduction <add>, %76, %cst_37 [1] : vector<8x8xf32> to vector<8xf32>
    %78 = vector.shape_cast %77 : vector<8xf32> to vector<8x1xf32>
    %79 = tpu.reciprocal %78 {approx = true} : vector<8x1xf32> -> vector<8x1xf32>
    %80 = vector.broadcast %79 : vector<8x1xf32> to vector<8x8xf32>
    %81 = arith.mulf %76, %80 : vector<8x8xf32>
    %82 = vector.extract_strided_slice %11 {offsets = [0, 16], sizes = [8, 8], strides = [1, 1]} : vector<8x32xf32> to vector<8x8xf32>
    %cst_38 = arith.constant dense<0.000000e+00> : vector<8x8xf32>
    %83 = tpu.matmul %81, %82, %cst_38 {dimension_numbers = #tpu.dot_dimension_numbers<[1], [0], [0], [1], [0, 0, 1, 1], [], []>} : vector<8x8xf32>, vector<8x8xf32>, vector<8x8xf32> -> vector<8x8xf32>
    %c16 = arith.constant 16 : index
    %c0_39 = arith.constant 0 : index
    %84 = vector.load %arg6[%c16, %c0_39] : memref<32x32xf32, #tpu.memory_space<vmem>>, vector<8x32xf32>
    %cst_40 = arith.constant dense<0.000000e+00> : vector<8x32xf32>
    %85 = tpu.matmul %83, %84, %cst_40 {dimension_numbers = #tpu.dot_dimension_numbers<[1], [0], [0], [1], [0, 0, 1, 1], [], []>} : vector<8x8xf32>, vector<8x32xf32>, vector<8x32xf32> -> vector<8x32xf32>
    %86 = arith.addf %61, %85 : vector<8x32xf32>
    %87 = vector.extract_strided_slice %7 {offsets = [0, 24], sizes = [8, 8], strides = [1, 1]} : vector<8x32xf32> to vector<8x8xf32>
    %88 = vector.extract_strided_slice %10 {offsets = [0, 24], sizes = [8, 8], strides = [1, 1]} : vector<8x32xf32> to vector<8x8xf32>
    %89 = tpu.transpose %88, [1, 0] : vector<8x8xf32> -> vector<8x8xf32>
    %cst_41 = arith.constant dense<0.000000e+00> : vector<8x8xf32>
    %90 = tpu.matmul %87, %89, %cst_41 {dimension_numbers = #tpu.dot_dimension_numbers<[1], [0], [0], [1], [0, 0, 1, 1], [], []>} : vector<8x8xf32>, vector<8x8xf32>, vector<8x8xf32> -> vector<8x8xf32>
    %cst_42 = arith.constant 0.353553385 : f32
    %91 = vector.broadcast %cst_42 : f32 to vector<8x8xf32>
    %92 = arith.mulf %90, %91 : vector<8x8xf32>
    %cst_43 = arith.constant 0.000000e+00 : f32
    %93 = vector.broadcast %cst_43 : f32 to vector<8x8xf32>
    %94 = arith.cmpf ogt, %5, %93 : vector<8x8xf32>
    %cst_44 = arith.constant -1.000000e+09 : f32
    %95 = vector.broadcast %cst_44 : f32 to vector<8x8xf32>
    %96 = arith.select %94, %95, %92 : vector<8x8xi1>, vector<8x8xf32>
    %cst_45 = arith.constant dense<0xFF800000> : vector<8xf32>
    %97 = vector.multi_reduction <maximumf>, %96, %cst_45 [1] : vector<8x8xf32> to vector<8xf32>
    %98 = vector.shape_cast %97 : vector<8xf32> to vector<8x1xf32>
    %99 = vector.broadcast %98 : vector<8x1xf32> to vector<8x8xf32>
    %100 = arith.subf %96, %99 : vector<8x8xf32>
    %101 = math.exp %100 : vector<8x8xf32>
    %cst_46 = arith.constant dense<0.000000e+00> : vector<8xf32>
    %102 = vector.multi_reduction <add>, %101, %cst_46 [1] : vector<8x8xf32> to vector<8xf32>
    %103 = vector.shape_cast %102 : vector<8xf32> to vector<8x1xf32>
    %104 = tpu.reciprocal %103 {approx = true} : vector<8x1xf32> -> vector<8x1xf32>
    %105 = vector.broadcast %104 : vector<8x1xf32> to vector<8x8xf32>
    %106 = arith.mulf %101, %105 : vector<8x8xf32>
    %107 = vector.extract_strided_slice %11 {offsets = [0, 24], sizes = [8, 8], strides = [1, 1]} : vector<8x32xf32> to vector<8x8xf32>
    %cst_47 = arith.constant dense<0.000000e+00> : vector<8x8xf32>
    %108 = tpu.matmul %106, %107, %cst_47 {dimension_numbers = #tpu.dot_dimension_numbers<[1], [0], [0], [1], [0, 0, 1, 1], [], []>} : vector<8x8xf32>, vector<8x8xf32>, vector<8x8xf32> -> vector<8x8xf32>
    %c24 = arith.constant 24 : index
    %c0_48 = arith.constant 0 : index
    %109 = vector.load %arg6[%c24, %c0_48] : memref<32x32xf32, #tpu.memory_space<vmem>>, vector<8x32xf32>
    %cst_49 = arith.constant dense<0.000000e+00> : vector<8x32xf32>
    %110 = tpu.matmul %108, %109, %cst_49 {dimension_numbers = #tpu.dot_dimension_numbers<[1], [0], [0], [1], [0, 0, 1, 1], [], []>} : vector<8x8xf32>, vector<8x32xf32>, vector<8x32xf32> -> vector<8x32xf32>
    %111 = arith.addf %86, %110 : vector<8x32xf32>
    %cst_50 = arith.constant dense<0.000000e+00> : vector<8xf32>
    %112 = vector.multi_reduction <add>, %111, %cst_50 [1] : vector<8x32xf32> to vector<8xf32>
    %113 = vector.shape_cast %112 : vector<8xf32> to vector<8x1xf32>
    %cst_51 = arith.constant 3.200000e+01 : f32
    %114 = vector.broadcast %cst_51 : f32 to vector<8x1xf32>
    %115 = arith.divf %113, %114 : vector<8x1xf32>
    %116 = vector.broadcast %115 : vector<8x1xf32> to vector<8x32xf32>
    %117 = arith.subf %111, %116 : vector<8x32xf32>
    %118 = arith.mulf %117, %117 : vector<8x32xf32>
    %cst_52 = arith.constant dense<0.000000e+00> : vector<8xf32>
    %119 = vector.multi_reduction <add>, %118, %cst_52 [1] : vector<8x32xf32> to vector<8xf32>
    %120 = vector.shape_cast %119 : vector<8xf32> to vector<8x1xf32>
    %cst_53 = arith.constant 3.200000e+01 : f32
    %121 = vector.broadcast %cst_53 : f32 to vector<8x1xf32>
    %122 = arith.divf %120, %121 : vector<8x1xf32>
    %123 = vector.broadcast %115 : vector<8x1xf32> to vector<8x32xf32>
    %124 = arith.subf %111, %123 : vector<8x32xf32>
    %cst_54 = arith.constant 9.99999974E-6 : f32
    %125 = vector.broadcast %cst_54 : f32 to vector<8x1xf32>
    %126 = arith.addf %122, %125 : vector<8x1xf32>
    %127 = math.rsqrt %126 : vector<8x1xf32>
    %128 = vector.broadcast %127 : vector<8x1xf32> to vector<8x32xf32>
    %129 = arith.mulf %124, %128 : vector<8x32xf32>
    %c0_55 = arith.constant 0 : index
    %c0_56 = arith.constant 0 : index
    %c0_57 = arith.constant 0 : index
    %130 = vector.load %arg7[%c0_55, %c0_56, %c0_57] : memref<1x8x32xf32, #tpu.memory_space<vmem>>, vector<1x8x32xf32>
    %131 = vector.shape_cast %130 : vector<1x8x32xf32> to vector<8x32xf32>
    %132 = vector.shape_cast %129 : vector<8x32xf32> to vector<1x8x32xf32>
    tpu.vector_store %arg7[%c0_55, %c0_56, %c0_57], %132 {strides = array<i32>} : memref<1x8x32xf32, #tpu.memory_space<vmem>>, vector<1x8x32xf32>,
    return
  }
  func.func @transform_0(%arg0: i32) -> (i32, i32, i32) {
    %c0_i32 = arith.constant 0 : i32
    %c0_i32_0 = arith.constant 0 : i32
    %c0_i32_1 = arith.constant 0 : i32
    return %arg0, %c0_i32, %c0_i32_0 : i32, i32, i32
  }
  func.func @transform_1(%arg0: i32) -> (i32, i32, i32) {
    %c0_i32 = arith.constant 0 : i32
    %c0_i32_0 = arith.constant 0 : i32
    %c0_i32_1 = arith.constant 0 : i32
    return %arg0, %c0_i32, %c0_i32_0 : i32, i32, i32
  }
  func.func @transform_2(%arg0: i32) -> (i32, i32, i32) {
    %c0_i32 = arith.constant 0 : i32
    %c0_i32_0 = arith.constant 0 : i32
    %c0_i32_1 = arith.constant 0 : i32
    return %arg0, %c0_i32, %c0_i32_0 : i32, i32, i32
  }
  func.func @transform_3(%arg0: i32) -> (i32, i32) {
    %c0_i32 = arith.constant 0 : i32
    %c0_i32_0 = arith.constant 0 : i32
    %c0_i32_1 = arith.constant 0 : i32
    return %c0_i32, %c0_i32_0 : i32, i32
  }
  func.func @transform_4(%arg0: i32) -> (i32, i32) {
    %c0_i32 = arith.constant 0 : i32
    %c0_i32_0 = arith.constant 0 : i32
    %c0_i32_1 = arith.constant 0 : i32
    return %c0_i32, %c0_i32_0 : i32, i32
  }
  func.func @transform_5(%arg0: i32) -> (i32, i32) {
    %c0_i32 = arith.constant 0 : i32
    %c0_i32_0 = arith.constant 0 : i32
    %c0_i32_1 = arith.constant 0 : i32
    return %c0_i32, %c0_i32_0 : i32, i32
  }
  func.func @transform_6(%arg0: i32) -> (i32, i32, i32) {
    %c0_i32 = arith.constant 0 : i32
    %c0_i32_0 = arith.constant 0 : i32
    %c0_i32_1 = arith.constant 0 : i32
    return %arg0, %c0_i32, %c0_i32_0 : i32, i32, i32
  }
}

module attributes {stable_mosaic.version = 11 : i64} {
  func.func @_ffn_block_kernel(%arg0: i32, %arg1: memref<1x8x32xf32, #tpu.memory_space<vmem>>, %arg2: memref<32x64xf32, #tpu.memory_space<vmem>>, %arg3: memref<1x64xf32, #tpu.memory_space<vmem>>, %arg4: memref<64x32xf32, #tpu.memory_space<vmem>>, %arg5: memref<1x32xf32, #tpu.memory_space<vmem>>, %arg6: memref<1x8x32xf32, #tpu.memory_space<vmem>>) attributes {dimension_semantics = [#tpu.dimension_semantics<parallel>], iteration_bounds = array<i64: 2>, scalar_prefetch = 0 : i64, scratch_operands = 0 : i64, tpu.core_type = #tpu.core_type<tc>, window_params = [{transform_indices = @transform_0, window_bounds = array<i64: 1, 8, 32>}, {pipeline_mode = #tpu.pipeline_mode<synchronous>, transform_indices = @transform_1, window_bounds = array<i64: 32, 64>}, {pipeline_mode = #tpu.pipeline_mode<synchronous>, transform_indices = @transform_2, window_bounds = array<i64: 1, 64>}, {pipeline_mode = #tpu.pipeline_mode<synchronous>, transform_indices = @transform_3, window_bounds = array<i64: 64, 32>}, {pipeline_mode = #tpu.pipeline_mode<synchronous>, transform_indices = @transform_4, window_bounds = array<i64: 1, 32>}, {transform_indices = @transform_5, window_bounds = array<i64: 1, 8, 32>}]} {
    %c0 = arith.constant 0 : index
    %c0_0 = arith.constant 0 : index
    %c0_1 = arith.constant 0 : index
    %0 = vector.load %arg1[%c0, %c0_0, %c0_1] : memref<1x8x32xf32, #tpu.memory_space<vmem>>, vector<1x8x32xf32>
    %1 = vector.shape_cast %0 : vector<1x8x32xf32> to vector<8x32xf32>
    %c0_2 = arith.constant 0 : index
    %c0_3 = arith.constant 0 : index
    %2 = vector.load %arg2[%c0_2, %c0_3] : memref<32x64xf32, #tpu.memory_space<vmem>>, vector<32x64xf32>
    %cst = arith.constant dense<0.000000e+00> : vector<8x64xf32>
    %3 = tpu.matmul %1, %2, %cst {dimension_numbers = #tpu.dot_dimension_numbers<[1], [0], [0], [1], [0, 0, 1, 1], [], []>} : vector<8x32xf32>, vector<32x64xf32>, vector<8x64xf32> -> vector<8x64xf32>
    %c0_4 = arith.constant 0 : index
    %c0_5 = arith.constant 0 : index
    %4 = vector.load %arg3[%c0_4, %c0_5] : memref<1x64xf32, #tpu.memory_space<vmem>>, vector<1x64xf32>
    %5 = vector.broadcast %4 : vector<1x64xf32> to vector<8x64xf32>
    %6 = arith.addf %3, %5 : vector<8x64xf32>
    %cst_6 = arith.constant 0.000000e+00 : f32
    %7 = vector.broadcast %cst_6 : f32 to vector<8x64xf32>
    %8 = arith.maximumf %6, %7 : vector<8x64xf32>
    %c0_7 = arith.constant 0 : index
    %c0_8 = arith.constant 0 : index
    %9 = vector.load %arg4[%c0_7, %c0_8] : memref<64x32xf32, #tpu.memory_space<vmem>>, vector<64x32xf32>
    %cst_9 = arith.constant dense<0.000000e+00> : vector<8x32xf32>
    %10 = tpu.matmul %8, %9, %cst_9 {dimension_numbers = #tpu.dot_dimension_numbers<[1], [0], [0], [1], [0, 0, 1, 1], [], []>} : vector<8x64xf32>, vector<64x32xf32>, vector<8x32xf32> -> vector<8x32xf32>
    %c0_10 = arith.constant 0 : index
    %c0_11 = arith.constant 0 : index
    %11 = vector.load %arg5[%c0_10, %c0_11] : memref<1x32xf32, #tpu.memory_space<vmem>>, vector<1x32xf32>
    %12 = vector.broadcast %11 : vector<1x32xf32> to vector<8x32xf32>
    %13 = arith.addf %10, %12 : vector<8x32xf32>
    %14 = arith.addf %13, %1 : vector<8x32xf32>
    %cst_12 = arith.constant dense<0.000000e+00> : vector<8xf32>
    %15 = vector.multi_reduction <add>, %14, %cst_12 [1] : vector<8x32xf32> to vector<8xf32>
    %16 = vector.shape_cast %15 : vector<8xf32> to vector<8x1xf32>
    %cst_13 = arith.constant 3.200000e+01 : f32
    %17 = vector.broadcast %cst_13 : f32 to vector<8x1xf32>
    %18 = arith.divf %16, %17 : vector<8x1xf32>
    %19 = vector.broadcast %18 : vector<8x1xf32> to vector<8x32xf32>
    %20 = arith.subf %14, %19 : vector<8x32xf32>
    %21 = arith.mulf %20, %20 : vector<8x32xf32>
    %cst_14 = arith.constant dense<0.000000e+00> : vector<8xf32>
    %22 = vector.multi_reduction <add>, %21, %cst_14 [1] : vector<8x32xf32> to vector<8xf32>
    %23 = vector.shape_cast %22 : vector<8xf32> to vector<8x1xf32>
    %cst_15 = arith.constant 3.200000e+01 : f32
    %24 = vector.broadcast %cst_15 : f32 to vector<8x1xf32>
    %25 = arith.divf %23, %24 : vector<8x1xf32>
    %26 = vector.broadcast %18 : vector<8x1xf32> to vector<8x32xf32>
    %27 = arith.subf %14, %26 : vector<8x32xf32>
    %cst_16 = arith.constant 9.99999974E-6 : f32
    %28 = vector.broadcast %cst_16 : f32 to vector<8x1xf32>
    %29 = arith.addf %25, %28 : vector<8x1xf32>
    %30 = math.rsqrt %29 : vector<8x1xf32>
    %31 = vector.broadcast %30 : vector<8x1xf32> to vector<8x32xf32>
    %32 = arith.mulf %27, %31 : vector<8x32xf32>
    %c0_17 = arith.constant 0 : index
    %c0_18 = arith.constant 0 : index
    %c0_19 = arith.constant 0 : index
    %33 = vector.load %arg6[%c0_17, %c0_18, %c0_19] : memref<1x8x32xf32, #tpu.memory_space<vmem>>, vector<1x8x32xf32>
    %34 = vector.shape_cast %33 : vector<1x8x32xf32> to vector<8x32xf32>
    %35 = vector.shape_cast %32 : vector<8x32xf32> to vector<1x8x32xf32>
    tpu.vector_store %arg6[%c0_17, %c0_18, %c0_19], %35 {strides = array<i32>} : memref<1x8x32xf32, #tpu.memory_space<vmem>>, vector<1x8x32xf32>,
    return
  }
  func.func @transform_0(%arg0: i32) -> (i32, i32, i32) {
    %c0_i32 = arith.constant 0 : i32
    %c0_i32_0 = arith.constant 0 : i32
    %c0_i32_1 = arith.constant 0 : i32
    return %arg0, %c0_i32, %c0_i32_0 : i32, i32, i32
  }
  func.func @transform_1(%arg0: i32) -> (i32, i32) {
    %c0_i32 = arith.constant 0 : i32
    %c0_i32_0 = arith.constant 0 : i32
    %c0_i32_1 = arith.constant 0 : i32
    return %c0_i32, %c0_i32_0 : i32, i32
  }
  func.func @transform_2(%arg0: i32) -> (i32, i32) {
    %c0_i32 = arith.constant 0 : i32
    %c0_i32_0 = arith.constant 0 : i32
    %c0_i32_1 = arith.constant 0 : i32
    return %c0_i32, %c0_i32_0 : i32, i32
  }
  func.func @transform_3(%arg0: i32) -> (i32, i32) {
    %c0_i32 = arith.constant 0 : i32
    %c0_i32_0 = arith.constant 0 : i32
    %c0_i32_1 = arith.constant 0 : i32
    return %c0_i32, %c0_i32_0 : i32, i32
  }
  func.func @transform_4(%arg0: i32) -> (i32, i32) {
    %c0_i32 = arith.constant 0 : i32
    %c0_i32_0 = arith.constant 0 : i32
    %c0_i32_1 = arith.constant 0 : i32
    return %c0_i32, %c0_i32_0 : i32, i32
  }
  func.func @transform_5(%arg0: i32) -> (i32, i32, i32) {
    %c0_i32 = arith.constant 0 : i32
    %c0_i32_0 = arith.constant 0 : i32
    %c0_i32_1 = arith.constant 0 : i32
    return %arg0, %c0_i32, %c0_i32_0 : i32, i32, i32
  }
}

module attributes {stable_mosaic.version = 11 : i64} {
  func.func @_linear_bias_kernel(%arg0: memref<16x32xf32, #tpu.memory_space<vmem>>, %arg1: memref<32x128xf32, #tpu.memory_space<vmem>>, %arg2: memref<1x128xf32, #tpu.memory_space<vmem>>, %arg3: memref<16x128xf32, #tpu.memory_space<vmem>>) attributes {dimension_semantics = [], scalar_prefetch = 0 : i64, scratch_operands = 0 : i64, tpu.core_type = #tpu.core_type<tc>} {
    %c0 = arith.constant 0 : index
    %c0_0 = arith.constant 0 : index
    %0 = vector.load %arg0[%c0, %c0_0] : memref<16x32xf32, #tpu.memory_space<vmem>>, vector<16x32xf32>
    %c0_1 = arith.constant 0 : index
    %c0_2 = arith.constant 0 : index
    %1 = vector.load %arg1[%c0_1, %c0_2] : memref<32x128xf32, #tpu.memory_space<vmem>>, vector<32x128xf32>
    %cst = arith.constant dense<0.000000e+00> : vector<16x128xf32>
    %2 = tpu.matmul %0, %1, %cst {dimension_numbers = #tpu.dot_dimension_numbers<[1], [0], [0], [1], [0, 0, 1, 1], [], []>} : vector<16x32xf32>, vector<32x128xf32>, vector<16x128xf32> -> vector<16x128xf32>
    %c0_3 = arith.constant 0 : index
    %c0_4 = arith.constant 0 : index
    %3 = vector.load %arg2[%c0_3, %c0_4] : memref<1x128xf32, #tpu.memory_space<vmem>>, vector<1x128xf32>
    %4 = vector.broadcast %3 : vector<1x128xf32> to vector<16x128xf32>
    %5 = arith.addf %2, %4 : vector<16x128xf32>
    %c0_5 = arith.constant 0 : index
    %c0_6 = arith.constant 0 : index
    %6 = vector.load %arg3[%c0_5, %c0_6] : memref<16x128xf32, #tpu.memory_space<vmem>>, vector<16x128xf32>
    tpu.vector_store %arg3[%c0_5, %c0_6], %5 {strides = array<i32>} : memref<16x128xf32, #tpu.memory_space<vmem>>, vector<16x128xf32>,
    return
  }
}

</mosaic_0001>

<bundles_post_ra>
// kernel: transformer_forward.21
= control target key start
LH: loop header
LB: loop body
LE: loop exit
PB: predicated region body
PF: predicated region fallthrough
CT: control target
= control target key end

     0   :  { %s158_s0 = inlined_call_operand.vmem [shape: f32[16,32], index: 0, kind: input, shape index: {}]   ;;  %s159_s1 = inlined_call_operand.vmem [shape: f32[32,128], index: 1, kind: input, shape index: {}]   ;;  %s160_s2 = inlined_call_operand.vmem [shape: f32[1,128], index: 2, kind: input, shape index: {}]   ;;  %s161_s3 = inlined_call_operand.hbm [shape: f32[16,128], index: 3, kind: output, shape index: {}]  }
   0x1   :  { %v20_v0 = vld [vmem:[%s159_s1 + $0x18] sm:$0xff]  ;;  %v19_v1 = vld [vmem:[%s159_s1 + $0x10] sm:$0xff]  ;;  %v18_v2 = vld [vmem:[%s159_s1 + $0x8] sm:$0xff] }
   0x2   :  { %44 = vmatpush.msra.mxu0 %v20_v0  ;;  %77 = vmatpush.msra.mxu1 %v20_v0 }
   0x3   :  { %8 = vsyncpa [#allocation3], 0  ;;  %v17_v3 = vld [vmem:[%s159_s1] sm:$0xff]  ;;  %vm25_vm0 = vcmask 261120   ;;  %v16_v5 = vld [vmem:[%s158_s0 + $0x8] sm:$0xff]  ;;  %s111_s1 = smov [#allocation2]  }
   0x4   :  { %45 = vmatpush.msra.mxu0 %v19_v1  ;;  %78 = vmatpush.msra.mxu1 %v19_v1  ;;  %v15_v4 = vld [vmem:[%s158_s0] sm:$0xff]  ;;  %s61_s26 = sshll.u32 %s111_s1, 4  ;;  %s63_s29 = sshll.u32 %s161_s3, 4  ;;  %s62_s26 = int_to_ptr.vmem [resolvable:$true] %s61_s26  ;;  %s64_s29 = int_to_ptr.hbm [resolvable:$true] %s63_s29 }
   0x5   :  { %v84_v6 = vld [vmem:[%s160_s2] ss:$0 sm:$0xff]  ;;  %s112_s0 = smov 128   ;;  %s113_s30 = smov 8  }
   0x6   :  { %46 = vmatpush.msra.mxu0 %v18_v2  ;;  %79 = vmatpush.msra.mxu1 %v18_v2 }
   0x8   :  { %47 = vmatpush.msra.mxu0 %v17_v3  ;;  %80 = vmatpush.msra.mxu1 %v17_v3 }
   0x9   :  { %75 = vmatmul.msk.f32.vlgmr.msra.gmra.mxu0 %vm25_vm0, %v15_v4  ;;  %76 = vmatmul.msk.f32.vlgmr.msra.gmra.mxu1 %vm25_vm0, %v16_v5 }
  0x86   :  { %v49_v7 = vpop.f32.mrf.mxu0  ;;  %v52_v8 = vpop.f32.mrf.mxu1 }
  0x87   :  { %v50_v9 = vadd.f32 %v84_v6, %v49_v7  ;;  %v53_v10 = vadd.f32 %v84_v6, %v52_v8 }
  0x89   :  { %55 = vst [vmem:[#allocation2] sm:$0xff] %v50_v9 }
  0x8a   :  { %56 = vst [vmem:[#allocation2 + $0x8] sm:$0xff] %v53_v10 }
  0x8b   :  { %69 = dma.vmem_to_hbm [thread:$0]  %s62_s26, 256, %s64_s29, [#allocation3], %s112_s0, %s112_s0, %s113_s30  }
  0x8c   :  { %109 = dma.done.wait [#allocation3], 256  }
  0x8d   :  { %110 = vsyncadd [#allocation3], 4294967040 }
  0x8e   :  { %74 = vsyncpa [#allocation3], 1 }

// kernel: transformer_forward.12
= control target key start
LH: loop header
LB: loop body
LE: loop exit
PB: predicated region body
PF: predicated region fallthrough
CT: control target
= control target key end

     0   :  { %s439_s18 = smov 0   ;;  %s509_s0 = inlined_call_operand.vmem [shape: f32[2,8,32], index: 0, kind: input, shape index: {}]   ;;  %s510_s1 = inlined_call_operand.vmem [shape: f32[32,64], index: 1, kind: input, shape index: {}]   ;;  %s511_s2 = inlined_call_operand.vmem [shape: f32[1,64], index: 2, kind: input, shape index: {}]   ;;  %s512_s3 = inlined_call_operand.vmem [shape: f32[64,32], index: 3, kind: input, shape index: {}]   ;;  %s513_s4 = inlined_call_operand.vmem [shape: f32[1,32], index: 4, kind: input, shape index: {}]   ;;  %s514_s5 = inlined_call_operand.vmem [shape: f32[2,8,32], index: 5, kind: output, shape index: {}]  }
   0x1 LB: > { %s374_s19 = sadd.s32 4294967295, %s406_s18   ;;  %p378_p0 = scmp.ge.s32.totalorder %s406_s18, 1  ;;  %s406_s18 = sphi %s439_s18, %s15_s18  }
   0x2   : > { %p186_p1 = scmp.lt.s32.totalorder %s406_s18, 3 }
   0x4   : > { %p187_p2 = pnand %p378_p0, %p186_p1 }
   0x5   : > { %p212_p3 = scmp.lt.s32.totalorder (!%p187_p2), %s374_s19, 1 }
   0x6   : > { %190 = sbr.rel (%p187_p2) target bundleno = 544 (0x220), region = 40 }
   0xb   : > { %v224_v0 = vld [vmem:[%s510_s1 + $0x18] sm:$0xff]  ;;  %v223_v1 = vld [vmem:[%s510_s1 + $0x10] sm:$0xff]  ;;  %v222_v4 = vld [vmem:[%s510_s1 + $0x8] sm:$0xff]  ;;  %s516_s19 = smov (!%p212_p3, %s374_s19), 1  ;;  %vm229_vm0 = vcmask 261120   ;;  %vm266_vm1 = vcmask 523264  }
   0xc   : > { %245 = vmatpush.msra.mxu0 %v224_v0  ;;  %v261_v2 = vld [vmem:[%s512_s3 + $0x38] sm:$0xff]  ;;  %v260_v3 = vld [vmem:[%s512_s3 + $0x30] sm:$0xff]  ;;  %v259_v5 = vld [vmem:[%s512_s3 + $0x28] sm:$0xff]  ;;  %s379_s9 = sshll.u32 %s516_s19, 3  ;;  %v408_v22 = vmov 32.0  }
   0xd   : > { %278 = vmatpush.msra.mxu1 %v261_v2  ;;  %v221_v6 = vld [vmem:[%s510_s1] sm:$0xff]  ;;  %s215_s12 = scalar_lea.vmem %s509_s0, %s379_s9  ;;  %v257_v9 = vld [vmem:[%s512_s3 + $0x18] sm:$0xff]  ;;  %v256_v10 = vld [vmem:[%s512_s3 + $0x10] sm:$0xff]  ;;  %396 = vrcp.f32 %v408_v22  ;;  %s219_s6 = scalar_lea.vmem %s514_s5, %s379_s9 }
   0xe   : > { %246 = vmatpush.msra.mxu0 %v223_v1  ;;  %v258_v7 = vld [vmem:[%s512_s3 + $0x20] sm:$0xff]  ;;  %v255_v11 = vld [vmem:[%s512_s3 + $0x8] sm:$0xff] }
   0xf   : > { %279 = vmatpush.msra.mxu1 %v260_v3  ;;  %v220_v8 = vld [vmem:[%s215_s12] sm:$0xff] }
  0x10   : > { %247 = vmatpush.msra.mxu0 %v222_v4  ;;  %v254_v12 = vld [vmem:[%s512_s3] sm:$0xff] }
  0x11   : > { %280 = vmatpush.msra.mxu1 %v259_v5  ;;  %v394_v13 = vld [vmem:[%s511_s2] ss:$0 sm:$0xff] }
  0x12   : > { %248 = vmatpush.msra.mxu0 %v221_v6  ;;  %v395_v17 = vld [vmem:[%s513_s4] ss:$0 sm:$0xff] }
  0x13   : > { %381 = vmatmul.msk.f32.vlgmr.msra.gmra.mxu0 %vm229_vm0, %v220_v8  ;;  %281 = vmatpush.msra.mxu1 %v258_v7  ;;  %v397_v23 = vpop.eup %396 }
  0x14   : > { %v295_v24 = vmul.f32 32.0, %v397_v23  ;;  %vm299_vm2 = vweird.f32 %v397_v23 }
  0x15   : > { %282 = vmatpush.msra.mxu1 %v257_v9 }
  0x16   : > { %v296_v25 = vsub.f32 1.0, %v295_v24 }
  0x17   : > { %283 = vmatpush.msra.mxu1 %v256_v10 }
  0x18   : > { %v297_v26 = vmul.f32 %v397_v23, %v296_v25 }
  0x19   : > { %284 = vmatpush.msra.mxu1 %v255_v11 }
  0x1a   : > { %v298_v27 = vadd.f32 %v397_v23, %v297_v26 }
  0x1b   : > { %285 = vmatpush.msra.mxu1 %v254_v12 }
  0x1c   : > { %v300_v28 = vsel %vm299_vm2, %v397_v23, %v298_v27 }
  0x90   : > { %v250_v14 = vpop.f32.mrf.mxu0 }
  0x91   : > { %v251_v15 = vadd.f32 %v394_v13, %v250_v14 }
  0x93   : > { %v253_v16 = vmax.f32 %v251_v15, 0.0 }
  0x95   : > { %382 = vmatmul.msk.f32.vlgmr.msra.gmra.mxu1 %vm266_vm1, %v253_v16 }
 0x112   : > { %v287_v18 = vpop.f32.mrf.mxu1 }
 0x113   : > { %v288_v19 = vadd.f32 %v395_v17, %v287_v18 }
 0x115   : > { %v290_v20 = vadd.f32 %v288_v19, %v220_v8 }
 0x117   : > { %v291_v21 = vsel %vm229_vm0, %v290_v20, 0.0 }
 0x118   : > { %292 = vadd.xlane.f32.xlu0 %v291_v21 }
 0x18b   : > { %v293_v29 = vpop.xlane.xlu0 %292 }
 0x18c   : > { %v301_v30 = vmul.f32 %v300_v28, %v293_v29 }
 0x18e   : > { %v302_v31 = vsub.f32 %v290_v20, %v301_v30 }
 0x190   : > { %v303_v32 = vmul.f32 %v302_v31, %v302_v31 }
 0x192   : > { %v304_v33 = vsel %vm229_vm0, %v303_v32, 0.0 }
 0x193   : > { %305 = vadd.xlane.f32.xlu0 %v304_v33 }
 0x206   : > { %v306_v34 = vpop.xlane.xlu0 %305 }
 0x207   : > { %v307_v35 = vmul.f32 %v306_v34, %v300_v28 }
 0x209   : > { %v308_v36 = vadd.f32 1e-05, %v307_v35 }
 0x20b   : > { %398 = vrsqrt.f32 %v308_v36  ;;  %vm315_vm4 = vweird.f32 %v308_v36 }
 0x211   : > { %v399_v37 = vpop.eup %398 }
 0x212   : > { %v310_v38 = vmul.f32 %v399_v37, %v308_v36  ;;  %vm316_vm3 = vweird.f32 %v399_v37 }
 0x213   : > { %vm317_vm5 = vmor %vm315_vm4, %vm316_vm3 }
 0x214   : > { %v311_v39 = vmul.f32 %v399_v37, %v310_v38 }
 0x216   : > { %v312_v40 = vmul.f32 0.5, %v311_v39 }
 0x218   : > { %v313_v41 = vsub.f32 1.5, %v312_v40 }
 0x21a   : > { %v314_v42 = vmul.f32 %v399_v37, %v313_v41 }
 0x21c   : > { %v318_v43 = vsel %vm317_vm5, %v399_v37, %v314_v42 }
 0x21d   : > { %v319_v44 = vmul.f32 %v318_v43, %v302_v31 }
 0x21f   : > { %320 = vst.msk [vmem:[%s219_s6] sm:$0xff] %vm229_vm0, %v319_v44 }
 0x220 PF: > { %s15_s18 = sadd.s32 1, %s406_s18  }
 0x221   : > { %p12_p4 = scmp.ge.s32.totalorder %s15_s18, 4  }
 0x223   :  { %14 = sbr.rel (!%p12_p4) target bundleno = 1 (0x1), region = 70 }

// kernel: transformer_forward.11
= control target key start
LH: loop header
LB: loop body
LE: loop exit
PB: predicated region body
PF: predicated region fallthrough
CT: control target
= control target key end

     0   :  { %s930_s21 = smov 0   ;;  %s1051_s0 = inlined_call_operand.vmem [shape: f32[2,8,32], index: 0, kind: input, shape index: {}, may-alias: {0,1}]   ;;  %s1052_s1 = inlined_call_operand.vmem [shape: f32[2,8,32], index: 1, kind: input, shape index: {}, may-alias: {0,1}]   ;;  %s1053_s2 = inlined_call_operand.vmem [shape: f32[2,8,8], index: 2, kind: input, shape index: {}]   ;;  %s1054_s3 = inlined_call_operand.vmem [shape: f32[32,32], index: 3, kind: input, shape index: {}]   ;;  %s1055_s4 = inlined_call_operand.vmem [shape: f32[32,64], index: 4, kind: input, shape index: {}]   ;;  %s1056_s5 = inlined_call_operand.vmem [shape: f32[32,32], index: 5, kind: input, shape index: {}]   ;;  %s1057_s6 = inlined_call_operand.vmem [shape: f32[2,8,32], index: 6, kind: output, shape index: {}]  }
   0x1 LB: > { %s814_s22 = sadd.s32 4294967295, %s885_s21   ;;  %p818_p0 = scmp.ge.s32.totalorder %s885_s21, 1  ;;  %s885_s21 = sphi %s930_s21, %s16_s21  }
   0x2   : > { %p229_p1 = scmp.lt.s32.totalorder %s885_s21, 3 }
   0x4   : > { %p230_p2 = pnand %p818_p0, %p229_p1 }
   0x5   : > { %p265_p3 = scmp.lt.s32.totalorder (!%p230_p2), %s814_s22, 1  ;;  %s888_s24 = smov (!%p230_p2), 96  }
   0x6   : > { %233 = sbr.rel (%p230_p2) target bundleno = 1705 (0x6a9), region = 44  ;;  %s889_s25 = smov (!%p230_p2), 104  }
   0x7   : > { %s890_s26 = smov (!%p230_p2), 112   ;;  %s891_s8 = smov (!%p230_p2), 88  }
   0x8   : > { %s892_s11 = smov (!%p230_p2), 72   ;;  %s893_s12 = smov (!%p230_p2), 80  }
   0xb   : > { %v315_v0 = vld [vmem:[%s1055_s4 + $0x18] sm:$0xff]  ;;  %v314_v1 = vld [vmem:[%s1055_s4 + $0x10] sm:$0xff]  ;;  %v313_v4 = vld [vmem:[%s1055_s4 + $0x8] sm:$0xff]  ;;  %s1059_s22 = smov (!%p265_p3, %s814_s22), 1  ;;  %vm288_vm0 = vcmask 261120   ;;  %vm339_vm1 = vcmask 64512  }
   0xc   : > { %v287_v2 = vld [vmem:[%s1054_s3 + $0x18] sm:$0xff]  ;;  %331 = vmatpush.msra.mxu1 %v315_v0  ;;  %v286_v3 = vld [vmem:[%s1054_s3 + $0x10] sm:$0xff]  ;;  %v285_v5 = vld [vmem:[%s1054_s3 + $0x8] sm:$0xff]  ;;  %s959_s13 = sshll.u32 %s1059_s22, 3  ;;  %s887_s22 = smov 120  }
   0xd   : > { %304 = vmatpush.msra.mxu0 %v287_v2  ;;  %v312_v6 = vld [vmem:[%s1055_s4] sm:$0xff]  ;;  %s272_s18 = scalar_lea.vmem %s1052_s1, %s959_s13  ;;  %s268_s23 = scalar_lea.vmem %s1051_s0, %s959_s13  ;;  %v498_v12 = vld [vmem:[%s1056_s5 + $0x8] sm:$0xff] }
   0xe   : > { %332 = vmatpush.msra.mxu1 %v314_v1  ;;  %v284_v7 = vld [vmem:[%s1054_s3] sm:$0xff]  ;;  %s276_s7 = scalar_lea.vmem %s1053_s2, %s959_s13  ;;  %s280_s20 = scalar_lea.vmem %s1057_s6, %s959_s13 }
   0xf   : > { %305 = vmatpush.msra.mxu0 %v286_v3  ;;  %v282_v8 = vld [vmem:[%s272_s18] sm:$0xff] }
  0x10   : > { %333 = vmatpush.msra.mxu1 %v313_v4  ;;  %v972_v9 = vld [vmem:[%s268_s23] sm:$0xff] }
  0x11   : > { %306 = vmatpush.msra.mxu0 %v285_v5  ;;  %v995_v16 = vld [vmem:[%s276_s7] sm:$0xff] }
  0x12   : > { %334 = vmatpush.msra.mxu1 %v312_v6  ;;  %vm367_vm2 = vcmp.gt.f32.partialorder %v995_v16, 0.0  ;;  %v406_v40 = vld [vmem:[%s1056_s5] sm:$0xff] }
  0x13   : > { %307 = vmatpush.msra.mxu0 %v284_v7  ;;  %824 = vmatmul.msk.f32.vlgmr.msra.gmra.mxu1 %vm288_vm0, %v282_v8 }
  0x14   : > { %823 = vmatmul.msk.f32.vlgmr.msra.gmra.mxu0 %vm288_vm0, %v972_v9  ;;  %517 = vmatpush.msrb.mxu1 %v498_v12 }
  0x90   : > { %v977_v10 = vpop.f32.mrf.mxu1 }
  0x91   : > { %433 = vrot.lane.b32.xlu0 %v977_v10, %s887_s22  ;;  %825 = vmatpush.xpose.msk.msra.mxu2 %vm339_vm1, %v977_v10  ;;  %v309_v11 = vpop.f32.mrf.mxu0 }
  0x94   : > { %826 = vmatmul.msk.f32.vlgmr.msra.gmra.mxu2 %vm339_vm1, %v309_v11 }
  0x99   : > { %431 = vrot.lane.b32.xlu0 %v309_v11, %s887_s22 }
  0xa1   : > { %380 = vrot.lane.b32.xlu0 %v977_v10, %s888_s24 }
  0xa9   : > { %617 = vrot.lane.b32.xlu0 %v977_v10, %s889_s25 }
  0xb1   : > { %523 = vrot.lane.b32.xlu0 %v309_v11, %s890_s26 }
  0xb9   : > { %615 = vrot.lane.b32.xlu0 %v309_v11, %s889_s25 }
 0x103   : > { %v434_v13 = vpop.permute.xlu0 %433 }
 0x104   : > { %829 = vmatpush.xpose.msk.msrb.mxu2 %vm339_vm1, %v434_v13 }
 0x10b   : > { %v432_v14 = vpop.permute.xlu0 %431 }
 0x10c   : > { %830 = vmatmul.msk.f32.vlgmr.msrb.gmra.mxu2 %vm339_vm1, %v432_v14  ;;  %v682_v14 = vld [vmem:[%s1056_s5 + $0x18] sm:$0xff] }
 0x113   : > { %v381_v15 = vpop.permute.xlu0 %380 }
 0x114   : > { %401 = vmatpush.msra.mxu3 %v381_v15 }
 0x116   : > { %425 = vmatpush.msrb.mxu3 %v406_v40 }
 0x117   : > { %v363_v17 = vpop.f32.mrf.mxu2 }
 0x118   : > { %v366_v18 = vmul.f32 0.35355338, %v363_v17 }
 0x11a   : > { %v368_v19 = vsel %vm367_vm2, -1e+09, %v366_v18 }
 0x11b   : > { %v618_v20 = vpop.permute.xlu0 %617  ;;  %v369_v21 = vsel %vm339_vm1, %v368_v19, -inf }
 0x11c   : > { %837 = vmatpush.xpose.msk.msra.mxu1 %vm339_vm1, %v618_v20  ;;  %370 = vmax.xlane.f32.xlu1 %v369_v21 }
 0x123   : > { %v524_v46 = vpop.permute.xlu0 %523 }
 0x12b   : > { %v616_v48 = vpop.permute.xlu0 %615 }
 0x18f   : > { %v456_v22 = vpop.f32.mrf.mxu2  ;;  %v371_v23 = vpop.xlane.xlu1 %370 }
 0x190   : > { %v459_v24 = vmul.f32 0.35355338, %v456_v22  ;;  %v372_v25 = vsub.f32 %v368_v19, %v371_v23 }
 0x192   : > { %v373_v26 = vmul.f32 1.442695, %v372_v25  ;;  %v460_v27 = vsel %vm367_vm2, -1e+09, %v459_v24  ;;  %v894_v24 = vmov 32.0  }
 0x193   : > { %v461_v28 = vsel %vm339_vm1, %v460_v27, -inf }
 0x194   : > { %859 = vpow2.f32 %v373_v26  ;;  %462 = vmax.xlane.f32.xlu1 %v461_v28 }
 0x19a   : > { %v860_v29 = vpop.eup %859 }
 0x19b   : > { %v375_v30 = vsel %vm339_vm1, %v860_v29, 0.0 }
 0x19c   : > { %376 = vadd.xlane.f32.xlu2 %v375_v30 }
 0x1ad   : > { %472 = vrot.lane.b32.xlu1 %v977_v10, %s891_s8 }
 0x207   : > { %v463_v31 = vpop.xlane.xlu1 %462 }
 0x208   : > { %v464_v32 = vsub.f32 %v460_v27, %v463_v31 }
 0x20a   : > { %v465_v33 = vmul.f32 1.442695, %v464_v32 }
 0x20c   : > { %861 = vpow2.f32 %v465_v33 }
 0x20f   : > { %v377_v34 = vpop.xlane.xlu2 %376 }
 0x210   : > { %863 = vrcp.f32 %v377_v34 }
 0x212   : > { %v862_v35 = vpop.eup %861 }
 0x213   : > { %v467_v36 = vsel %vm339_vm1, %v862_v35, 0.0 }
 0x214   : > { %468 = vadd.xlane.f32.xlu2 %v467_v36 }
 0x216   : > { %v864_v37 = vpop.eup %863 }
 0x217   : > { %v379_v38 = vmul.f32 %v864_v37, %v860_v29 }
 0x219   : > { %827 = vmatmul.msk.f32.vlgmr.msra.gmra.mxu3 %vm339_vm1, %v379_v38 }
 0x21f   : > { %v473_v39 = vpop.permute.xlu1 %472 }
 0x220   : > { %493 = vmatpush.msrb.mxu0 %v473_v39 }
 0x22c   : > { %525 = vrot.lane.b32.xlu2 %v977_v10, %s890_s26 }
 0x287   : > { %v469_v41 = vpop.xlane.xlu2 %468 }
 0x288   : > { %865 = vrcp.f32 %v469_v41 }
 0x28e   : > { %v866_v42 = vpop.eup %865 }
 0x28f   : > { %v526_v43 = vpop.permute.xlu2 %525  ;;  %v471_v44 = vmul.f32 %v866_v42, %v862_v35 }
 0x290   : > { %833 = vmatpush.xpose.msk.msra.mxu3 %vm339_vm1, %v526_v43 }
 0x291   : > { %831 = vmatmul.msk.f32.vlgmr.msrb.gmra.mxu0 %vm339_vm1, %v471_v44 }
 0x29c   : > { %v403_v45 = vpop.f32.mrf.mxu3 }
 0x29d   : > { %828 = vmatmul.msk.f32.vlgmr.msrb.gmra.mxu3 %vm339_vm1, %v403_v45 }
 0x2a5   : > { %834 = vmatmul.msk.f32.vlgmr.msra.gmra.mxu3 %vm339_vm1, %v524_v46 }
 0x30e   : > { %v495_v47 = vpop.f32.mrf.mxu0 }
 0x30f   : > { %832 = vmatmul.msk.f32.vlgmr.msrb.gmra.mxu1 %vm339_vm1, %v495_v47 }
 0x317   : > { %838 = vmatmul.msk.f32.vlgmr.msra.gmra.mxu1 %vm339_vm1, %v616_v48 }
 0x320   : > { %v427_v49 = vpop.f32.mrf.mxu3 }
 0x321   : > { %v430_v54 = vadd.f32 %v427_v49, %v972_v9 }
 0x328   : > { %v548_v50 = vpop.f32.mrf.mxu3 }
 0x329   : > { %v551_v51 = vmul.f32 0.35355338, %v548_v50 }
 0x32b   : > { %v552_v52 = vsel %vm367_vm2, -1e+09, %v551_v51 }
 0x32c   : > { %v553_v53 = vsel %vm339_vm1, %v552_v52, -inf }
 0x32d   : > { %554 = vmax.xlane.f32.xlu1 %v553_v53 }
 0x346   : > { %656 = vrot.lane.b32.xlu1 %v977_v10, %s892_s11 }
 0x38c   : > { %v519_v55 = vpop.f32.mrf.mxu1 }
 0x38d   : > { %v522_v56 = vadd.f32 %v519_v55, %v430_v54 }
 0x394   : > { %v640_v57 = vpop.f32.mrf.mxu1 }
 0x395   : > { %v643_v58 = vmul.f32 0.35355338, %v640_v57 }
 0x397   : > { %v644_v59 = vsel %vm367_vm2, -1e+09, %v643_v58 }
 0x398   : > { %v645_v60 = vsel %vm339_vm1, %v644_v59, -inf }
 0x399   : > { %646 = vmax.xlane.f32.xlu2 %v645_v60 }
 0x3a0   : > { %v555_v61 = vpop.xlane.xlu1 %554 }
 0x3a1   : > { %v556_v62 = vsub.f32 %v552_v52, %v555_v61 }
 0x3a3   : > { %v557_v63 = vmul.f32 1.442695, %v556_v62 }
 0x3a5   : > { %867 = vpow2.f32 %v557_v63 }
 0x3ab   : > { %v868_v0 = vpop.eup %867 }
 0x3ac   : > { %v559_v1 = vsel %vm339_vm1, %v868_v0, 0.0 }
 0x3ad   : > { %560 = vadd.xlane.f32.xlu2 %v559_v1 }
 0x3b8   : > { %v657_v2 = vpop.permute.xlu1 %656 }
 0x3b9   : > { %677 = vmatpush.msrb.mxu3 %v657_v2 }
 0x3c5   : > { %564 = vrot.lane.b32.xlu2 %v977_v10, %s893_s12  ;;  %v590_v10 = vld [vmem:[%s1056_s5 + $0x10] sm:$0xff] }
 0x3c6   : > { %609 = vmatpush.msra.mxu0 %v590_v10 }
 0x40c   : > { %v647_v3 = vpop.xlane.xlu2 %646 }
 0x40d   : > { %v648_v4 = vsub.f32 %v644_v59, %v647_v3 }
 0x40f   : > { %v649_v5 = vmul.f32 1.442695, %v648_v4 }
 0x411   : > { %869 = vpow2.f32 %v649_v5 }
 0x417   : > { %v870_v6 = vpop.eup %869 }
 0x418   : > { %v651_v7 = vsel %vm339_vm1, %v870_v6, 0.0 }
 0x419   : > { %652 = vadd.xlane.f32.xlu0 %v651_v7 }
 0x420   : > { %v561_v8 = vpop.xlane.xlu2 %560 }
 0x421   : > { %871 = vrcp.f32 %v561_v8 }
 0x427   : > { %v872_v9 = vpop.eup %871 }
 0x428   : > { %v563_v11 = vmul.f32 %v872_v9, %v868_v0  ;;  %v565_v12 = vpop.permute.xlu2 %564 }
 0x429   : > { %585 = vmatpush.msra.mxu2 %v565_v12 }
 0x42a   : > { %835 = vmatmul.msk.f32.vlgmr.msra.gmra.mxu2 %vm339_vm1, %v563_v11 }
 0x42b   : > { %701 = vmatpush.msrb.mxu2 %v682_v14 }
 0x48c   : > { %v653_v13 = vpop.xlane.xlu0 %652 }
 0x48d   : > { %873 = vrcp.f32 %v653_v13 }
 0x48e   : > { %875 = vrcp.f32 %v894_v24 }
 0x493   : > { %v874_v15 = vpop.eup %873 }
 0x494   : > { %v655_v16 = vmul.f32 %v874_v15, %v870_v6  ;;  %v876_v25 = vpop.eup %875 }
 0x495   : > { %v711_v26 = vmul.f32 32.0, %v876_v25  ;;  %vm715_vm3 = vweird.f32 %v876_v25 }
 0x496   : > { %839 = vmatmul.msk.f32.vlgmr.msrb.gmra.mxu3 %vm339_vm1, %v655_v16 }
 0x497   : > { %v712_v27 = vsub.f32 1.0, %v711_v26 }
 0x499   : > { %v713_v28 = vmul.f32 %v876_v25, %v712_v27 }
 0x49b   : > { %v714_v29 = vadd.f32 %v876_v25, %v713_v28 }
 0x49d   : > { %v716_v30 = vsel %vm715_vm3, %v876_v25, %v714_v29 }
 0x4ad   : > { %v587_v17 = vpop.f32.mrf.mxu2 }
 0x4ae   : > { %836 = vmatmul.msk.f32.vlgmr.msra.gmra.mxu0 %vm339_vm1, %v587_v17 }
 0x519   : > { %v679_v18 = vpop.f32.mrf.mxu3 }
 0x51a   : > { %840 = vmatmul.msk.f32.vlgmr.msrb.gmra.mxu2 %vm339_vm1, %v679_v18 }
 0x52b   : > { %v611_v19 = vpop.f32.mrf.mxu0 }
 0x52c   : > { %v614_v20 = vadd.f32 %v611_v19, %v522_v56 }
 0x59d   : > { %v703_v21 = vpop.f32.mrf.mxu2 }
 0x59e   : > { %v706_v22 = vadd.f32 %v703_v21, %v614_v20 }
 0x5a0   : > { %v707_v23 = vsel %vm288_vm0, %v706_v22, 0.0 }
 0x5a1   : > { %708 = vadd.xlane.f32.xlu0 %v707_v23 }
 0x614   : > { %v709_v31 = vpop.xlane.xlu0 %708 }
 0x615   : > { %v717_v32 = vmul.f32 %v716_v30, %v709_v31 }
 0x617   : > { %v718_v33 = vsub.f32 %v706_v22, %v717_v32 }
 0x619   : > { %v719_v34 = vmul.f32 %v718_v33, %v718_v33 }
 0x61b   : > { %v720_v35 = vsel %vm288_vm0, %v719_v34, 0.0 }
 0x61c   : > { %721 = vadd.xlane.f32.xlu0 %v720_v35 }
 0x68f   : > { %v722_v36 = vpop.xlane.xlu0 %721 }
 0x690   : > { %v723_v37 = vmul.f32 %v722_v36, %v716_v30 }
 0x692   : > { %v724_v38 = vadd.f32 1e-05, %v723_v37 }
 0x694   : > { %877 = vrsqrt.f32 %v724_v38  ;;  %vm731_vm5 = vweird.f32 %v724_v38 }
 0x69a   : > { %v878_v39 = vpop.eup %877 }
 0x69b   : > { %v726_v40 = vmul.f32 %v878_v39, %v724_v38  ;;  %vm732_vm4 = vweird.f32 %v878_v39 }
 0x69c   : > { %vm733_vm6 = vmor %vm731_vm5, %vm732_vm4 }
 0x69d   : > { %v727_v41 = vmul.f32 %v878_v39, %v726_v40 }
 0x69f   : > { %v728_v42 = vmul.f32 0.5, %v727_v41 }
 0x6a1   : > { %v729_v43 = vsub.f32 1.5, %v728_v42 }
 0x6a3   : > { %v730_v44 = vmul.f32 %v878_v39, %v729_v43 }
 0x6a5   : > { %v734_v45 = vsel %vm733_vm6, %v878_v39, %v730_v44 }
 0x6a6   : > { %v735_v46 = vmul.f32 %v734_v45, %v718_v33 }
 0x6a8   : > { %736 = vst.msk [vmem:[%s280_s20] sm:$0xff] %vm288_vm0, %v735_v46 }
 0x6a9 PF: > { %s16_s21 = sadd.s32 1, %s885_s21  }
 0x6aa   : > { %p13_p4 = scmp.ge.s32.totalorder %s16_s21, 4  }
 0x6ac   :  { %15 = sbr.rel (!%p13_p4) target bundleno = 1 (0x1), region = 80 }

</bundles_post_ra>
